<compile_context>
chip_gen: v6e
topology: v6e:2x2x1
jax: 0.10.0
libtpu: 0.0.40
codegen_flags: <defaults>
</compile_context>

<pallas_src>
import functools

import jax
import jax.numpy as jnp
from jax.experimental import pallas as pl
from jax.experimental.pallas import tpu as pltpu

BN_EPS = 1e-5
LANE = 128


def _round_up(x, m):
    return ((x + m - 1) // m) * m


# ----------------------------------------------------------------------------
# Pallas kernel: whole MLP for one batch tile.
#   refs = (x_ref, w0, b0, w1, b1, ..., wL, bL, o_ref)
#   x / W operands in `compute_dtype`; accumulation + bias/ReLU epilogue in f32.
# ----------------------------------------------------------------------------
def _mlp_kernel(*refs, num_layers: int, compute_dtype):
    x_ref = refs[0]
    o_ref = refs[-1]
    wb = refs[1:-1]

    prec = (jax.lax.Precision.HIGHEST if compute_dtype == jnp.float32
            else jax.lax.Precision.DEFAULT)

    h = x_ref[...].astype(compute_dtype)          # in-kernel cast (VPU filler)
    for l in range(num_layers):
        w = wb[2 * l][...]
        b = wb[2 * l + 1][...]                    # (1, N) float32
        y = jnp.dot(h, w, preferred_element_type=jnp.float32,
                    precision=prec) + b           # bias (BN already folded in)
        if l < num_layers - 1:
            y = jnp.maximum(y, 0.0)               # torch.relu (hidden only)
            h = y.astype(compute_dtype)
        else:
            h = y                                 # output layer stays f32
    o_ref[...] = h.astype(o_ref.dtype)


# ----------------------------------------------------------------------------
# Host-side parameter prep: fold eval-mode BN into the next layer, pad lanes
# ----------------------------------------------------------------------------
def prepare_fused_params(params, compute_dtype=jnp.bfloat16):
    hidden = params["hidden"]
    layers = hidden + [params["out"]]

    raw = []
    prev_scale = prev_shift = None
    for idx, layer in enumerate(layers):
        w0, b0 = layer["w"], layer["b"]
        if prev_scale is not None:
            w_f = prev_scale[:, None] * w0        # diag(scale) @ W
            b_f = prev_shift @ w0 + b0            # shift @ W + b
        else:
            w_f, b_f = w0, b0
        raw.append((w_f, b_f))
        if idx < len(hidden):
            inv_std = 1.0 / jnp.sqrt(layer["running_var"] + BN_EPS)
            prev_scale = layer["gamma"] * inv_std
            prev_shift = layer["beta"] - layer["running_mean"] * prev_scale
        else:
            prev_scale = prev_shift = None

    weights, biases = [], []
    for li, (w_f, b_f) in enumerate(raw):
        k, n = w_f.shape
        # Output (lane) dim padded to 128 -> lane-dense stores / MXU tiles.
        # Contraction dim K: layer 0 kept at d_in (full-dim block is legal, no
        # 4x over-pad of narrow inputs); hidden layers' K is padded to match
        # the previous layer's 128-padded output width.
        n_pad = _round_up(n, LANE)
        k_pad = k if li == 0 else _round_up(k, LANE)
        # Padded rows/cols stay exactly 0 so padded lanes never leak.
        wp = jnp.zeros((k_pad, n_pad), jnp.float32).at[:k, :n].set(w_f)
        bp = jnp.zeros((1, n_pad), jnp.float32).at[0, :n].set(b_f)
        weights.append(wp.astype(compute_dtype))
        biases.append(bp)                         # bias stays f32 (epilogue)
    return weights, biases


# ----------------------------------------------------------------------------
# BlockSpec helpers
# ----------------------------------------------------------------------------
def _resident_spec(shape):
    """Same block every grid step -> VMEM-resident across the batch grid.

    Single-buffered (pl.Buffered(1)): with a constant index_map, double
    buffering would only double the weight stack's VMEM footprint.
    """
    index_map = lambda i: (0,) * len(shape)
    try:
        return pl.BlockSpec(shape, index_map, pipeline_mode=pl.Buffered(1))
    except Exception:  # graceful fallback if pipeline_mode is unavailable
        return pl.BlockSpec(shape, index_map)


def _choose_batch_tiling(m, batch_tile, row_mult):
    """Adaptive batch tile: bounds tail waste and feeds megacore >=2 steps."""
    n_tiles = max(pl.cdiv(m, batch_tile), 1)
    # v7x megacore: "parallel" only helps with >= 2 grid steps.
    if n_tiles < 2 and m >= 2 * row_mult:
        n_tiles = 2
    tm = _round_up(pl.cdiv(m, n_tiles), row_mult)
    n_tiles = pl.cdiv(m, tm)          # re-derive after rounding tm
    return tm, n_tiles


# ----------------------------------------------------------------------------
# Wrapper: one pallas_call for the whole network, tiled over the batch axis
# ----------------------------------------------------------------------------
@functools.partial(jax.jit,
                   static_argnames=("output_size", "compute_dtype",
                                    "batch_tile"))
def fused_mlp_forward(x, weights, biases, *, output_size,
                      compute_dtype=jnp.bfloat16, batch_tile=256):
    num_layers = len(weights)
    M, d_in = x.shape
    assert weights[0].shape[0] == d_in
    n_out_pad = weights[-1].shape[1]

    row_mult = 16 if jnp.dtype(compute_dtype) == jnp.dtype(jnp.bfloat16) else 8
    tm, n_tiles = _choose_batch_tiling(M, batch_tile, row_mult)

    # x fed directly (no host-side padded/cast copy); ragged tail blocks are
    # handled by Pallas (masked stores on the output side).
    in_specs = [pl.BlockSpec((tm, d_in), lambda i: (i, 0))]
    args = [x]
    for w, b in zip(weights, biases):
        in_specs.append(_resident_spec(w.shape))
        in_specs.append(_resident_spec(b.shape))
        args.append(w)
        args.append(b)

    # Explicit VMEM budget: resident weights/biases (single-buffered) +
    # double-buffered x / out tiles + f32 intermediates; 2x headroom,
    # floor 32 MiB (>= default on all chips), cap 100 MiB.
    n_max = max(max(w.shape[1] for w in weights), d_in)
    est = (sum(w.size * w.dtype.itemsize for w in weights)
           + sum(b.size * 4 for b in biases)
           + 2 * tm * d_in * x.dtype.itemsize
           + 2 * tm * n_out_pad * 4
           + 4 * tm * n_max * 4)
    vmem_limit = int(min(max(2 * est, 32 * 1024 * 1024), 100 * 1024 * 1024))
    # TODO(synk): if the resident weight stack itself exceeds ~40 MiB (v7x has
    # only 64 MiB physical VMEM), fall back to tiling the layer N/K dims
    # instead of keeping every weight VMEM-resident.

    kernel = functools.partial(_mlp_kernel, num_layers=num_layers,
                               compute_dtype=compute_dtype)

    out = pl.pallas_call(
        kernel,
        out_shape=jax.ShapeDtypeStruct((M, n_out_pad), jnp.float32),
        grid=(n_tiles,),
        in_specs=in_specs,
        out_specs=pl.BlockSpec((tm, n_out_pad), lambda i: (i, 0)),
        compiler_params=pltpu.CompilerParams(
            dimension_semantics=("parallel",),
            vmem_limit_bytes=vmem_limit),
    )(*args)

    return out[:, :output_size]                   # static slice


# ----------------------------------------------------------------------------
# Parameter construction (deterministic, synthetic) — mirrors the torch module
# ----------------------------------------------------------------------------
def init_params(key, input_size, hidden_sizes, output_size):
    params = {"hidden": [], "out": None}
    dims = [input_size] + list(hidden_sizes)
    for d_in, d_out in zip(dims[:-1], dims[1:]):
        key, kw, kb, kg, kbt, km, kv = jax.random.split(key, 7)
        layer = {
            "w": jax.random.normal(kw, (d_in, d_out), jnp.float32) * 0.1,
            "b": jax.random.normal(kb, (d_out,), jnp.float32) * 0.01,
            # BatchNorm1d parameters + running stats (eval mode)
            "gamma": 1.0 + 0.05 * jax.random.normal(kg, (d_out,), jnp.float32),
            "beta": 0.05 * jax.random.normal(kbt, (d_out,), jnp.float32),
            "running_mean": 0.05 * jax.random.normal(km, (d_out,), jnp.float32),
            "running_var": 1.0 + 0.1 * jax.nn.softplus(
                jax.random.normal(kv, (d_out,), jnp.float32)),
        }
        params["hidden"].append(layer)
    key, kw, kb = jax.random.split(key, 3)
    params["out"] = {
        "w": jax.random.normal(kw, (dims[-1], output_size), jnp.float32) * 0.1,
        "b": jax.random.normal(kb, (output_size,), jnp.float32) * 0.01,
    }
    return params


# ----------------------------------------------------------------------------
# Reference implementation (plain JAX, unfolded, f32) for sanity check
# ----------------------------------------------------------------------------
def reference_forward(params, x):
    for layer in params["hidden"]:
        y = jnp.maximum(x @ layer["w"] + layer["b"], 0.0)
        y = (y - layer["running_mean"]) / jnp.sqrt(layer["running_var"] + BN_EPS)
        x = y * layer["gamma"] + layer["beta"]
        # Dropout: identity in eval mode.
    out = params["out"]
    return x @ out["w"] + out["b"]


if __name__ == "__main__":
    batch = 8
    input_size = 32
    hidden_sizes = [64, 48]
    output_size = 10

    key = jax.random.PRNGKey(0)
    key, kx = jax.random.split(key)
    x = jax.random.normal(kx, (batch, input_size), jnp.float32)
    params = init_params(key, input_size, hidden_sizes, output_size)

    ref = reference_forward(params, x)

    # f32-operand path: strict correctness check against the reference.
    w_f32, b_f32 = prepare_fused_params(params, compute_dtype=jnp.float32)
    logits_f32 = jax.block_until_ready(
        fused_mlp_forward(x, w_f32, b_f32, output_size=output_size,
                          compute_dtype=jnp.float32))
    assert logits_f32.shape == (batch, output_size)
    assert jnp.allclose(logits_f32, ref, atol=2e-4, rtol=2e-4), \
        float(jnp.max(jnp.abs(logits_f32 - ref)))

    # bf16-operand path (MXU-native on all generations; the sensible default
    # on v5e where f32 matmul is emulated), f32 accumulation: loose check.
    w_bf16, b_bf16 = prepare_fused_params(params, compute_dtype=jnp.bfloat16)
    logits_bf16 = jax.block_until_ready(
        fused_mlp_forward(x, w_bf16, b_bf16, output_size=output_size,
                          compute_dtype=jnp.bfloat16))
    assert logits_bf16.shape == (batch, output_size)
    assert jnp.allclose(logits_bf16, ref, atol=5e-2, rtol=5e-2), \
        float(jnp.max(jnp.abs(logits_bf16 - ref)))

    print("KERNEL_OK")
</pallas_src>

<mosaic_0001>
module attributes {stable_mosaic.version = 11 : i64} {
  func.func @_mlp_kernel(%arg0: i32, %arg1: memref<8x32xf32, #tpu.memory_space<vmem>>, %arg2: memref<32x128xf32, #tpu.memory_space<vmem>>, %arg3: memref<1x128xf32, #tpu.memory_space<vmem>>, %arg4: memref<128x128xf32, #tpu.memory_space<vmem>>, %arg5: memref<1x128xf32, #tpu.memory_space<vmem>>, %arg6: memref<128x128xf32, #tpu.memory_space<vmem>>, %arg7: memref<1x128xf32, #tpu.memory_space<vmem>>, %arg8: memref<8x128xf32, #tpu.memory_space<vmem>>) attributes {dimension_semantics = [#tpu.dimension_semantics<parallel>], iteration_bounds = array<i64: 1>, scalar_prefetch = 0 : i64, scratch_operands = 0 : i64, tpu.core_type = #tpu.core_type<tc>, window_params = [{transform_indices = @transform_0, window_bounds = array<i64: 8, 32>}, {pipeline_mode = #tpu.pipeline_mode<synchronous>, transform_indices = @transform_1, window_bounds = array<i64: 32, 128>}, {pipeline_mode = #tpu.pipeline_mode<synchronous>, transform_indices = @transform_2, window_bounds = array<i64: 1, 128>}, {pipeline_mode = #tpu.pipeline_mode<synchronous>, transform_indices = @transform_3, window_bounds = array<i64: 128, 128>}, {pipeline_mode = #tpu.pipeline_mode<synchronous>, transform_indices = @transform_4, window_bounds = array<i64: 1, 128>}, {pipeline_mode = #tpu.pipeline_mode<synchronous>, transform_indices = @transform_5, window_bounds = array<i64: 128, 128>}, {pipeline_mode = #tpu.pipeline_mode<synchronous>, transform_indices = @transform_6, window_bounds = array<i64: 1, 128>}, {transform_indices = @transform_7, window_bounds = array<i64: 8, 128>}]} {
    %c0 = arith.constant 0 : index
    %c0_0 = arith.constant 0 : index
    %0 = vector.load %arg1[%c0, %c0_0] : memref<8x32xf32, #tpu.memory_space<vmem>>, vector<8x32xf32>
    %c0_1 = arith.constant 0 : index
    %c0_2 = arith.constant 0 : index
    %1 = vector.load %arg2[%c0_1, %c0_2] : memref<32x128xf32, #tpu.memory_space<vmem>>, vector<32x128xf32>
    %c0_3 = arith.constant 0 : index
    %c0_4 = arith.constant 0 : index
    %2 = vector.load %arg3[%c0_3, %c0_4] : memref<1x128xf32, #tpu.memory_space<vmem>>, vector<1x128xf32>
    %cst = arith.constant dense<0.000000e+00> : vector<8x128xf32>
    %3 = tpu.matmul %0, %1, %cst {dimension_numbers = #tpu.dot_dimension_numbers<[1], [0], [0], [1], [0, 0, 1, 1], [], []>, precision = #tpu.contract_precision<fp32>} : vector<8x32xf32>, vector<32x128xf32>, vector<8x128xf32> -> vector<8x128xf32>
    %4 = vector.broadcast %2 : vector<1x128xf32> to vector<8x128xf32>
    %5 = arith.addf %3, %4 : vector<8x128xf32>
    %cst_5 = arith.constant 0.000000e+00 : f32
    %6 = vector.broadcast %cst_5 : f32 to vector<8x128xf32>
    %7 = arith.maximumf %5, %6 : vector<8x128xf32>
    %c0_6 = arith.constant 0 : index
    %c0_7 = arith.constant 0 : index
    %8 = vector.load %arg4[%c0_6, %c0_7] : memref<128x128xf32, #tpu.memory_space<vmem>>, vector<128x128xf32>
    %c0_8 = arith.constant 0 : index
    %c0_9 = arith.constant 0 : index
    %9 = vector.load %arg5[%c0_8, %c0_9] : memref<1x128xf32, #tpu.memory_space<vmem>>, vector<1x128xf32>
    %cst_10 = arith.constant dense<0.000000e+00> : vector<8x128xf32>
    %10 = tpu.matmul %7, %8, %cst_10 {dimension_numbers = #tpu.dot_dimension_numbers<[1], [0], [0], [1], [0, 0, 1, 1], [], []>, precision = #tpu.contract_precision<fp32>} : vector<8x128xf32>, vector<128x128xf32>, vector<8x128xf32> -> vector<8x128xf32>
    %11 = vector.broadcast %9 : vector<1x128xf32> to vector<8x128xf32>
    %12 = arith.addf %10, %11 : vector<8x128xf32>
    %cst_11 = arith.constant 0.000000e+00 : f32
    %13 = vector.broadcast %cst_11 : f32 to vector<8x128xf32>
    %14 = arith.maximumf %12, %13 : vector<8x128xf32>
    %c0_12 = arith.constant 0 : index
    %c0_13 = arith.constant 0 : index
    %15 = vector.load %arg6[%c0_12, %c0_13] : memref<128x128xf32, #tpu.memory_space<vmem>>, vector<128x128xf32>
    %c0_14 = arith.constant 0 : index
    %c0_15 = arith.constant 0 : index
    %16 = vector.load %arg7[%c0_14, %c0_15] : memref<1x128xf32, #tpu.memory_space<vmem>>, vector<1x128xf32>
    %cst_16 = arith.constant dense<0.000000e+00> : vector<8x128xf32>
    %17 = tpu.matmul %14, %15, %cst_16 {dimension_numbers = #tpu.dot_dimension_numbers<[1], [0], [0], [1], [0, 0, 1, 1], [], []>, precision = #tpu.contract_precision<fp32>} : vector<8x128xf32>, vector<128x128xf32>, vector<8x128xf32> -> vector<8x128xf32>
    %18 = vector.broadcast %16 : vector<1x128xf32> to vector<8x128xf32>
    %19 = arith.addf %17, %18 : vector<8x128xf32>
    %c0_17 = arith.constant 0 : index
    %c0_18 = arith.constant 0 : index
    %20 = vector.load %arg8[%c0_17, %c0_18] : memref<8x128xf32, #tpu.memory_space<vmem>>, vector<8x128xf32>
    tpu.vector_store %arg8[%c0_17, %c0_18], %19 {strides = array<i32>} : memref<8x128xf32, #tpu.memory_space<vmem>>, vector<8x128xf32>,
    return
  }
  func.func @transform_0(%arg0: i32) -> (i32, i32) {
    %c0_i32 = arith.constant 0 : i32
    %c0_i32_0 = arith.constant 0 : i32
    return %arg0, %c0_i32 : i32, i32
  }
  func.func @transform_1(%arg0: i32) -> (i32, i32) {
    %c0_i32 = arith.constant 0 : i32
    %c0_i32_0 = arith.constant 0 : i32
    %c0_i32_1 = arith.constant 0 : i32
    return %c0_i32, %c0_i32_0 : i32, i32
  }
  func.func @transform_2(%arg0: i32) -> (i32, i32) {
    %c0_i32 = arith.constant 0 : i32
    %c0_i32_0 = arith.constant 0 : i32
    %c0_i32_1 = arith.constant 0 : i32
    return %c0_i32, %c0_i32_0 : i32, i32
  }
  func.func @transform_3(%arg0: i32) -> (i32, i32) {
    %c0_i32 = arith.constant 0 : i32
    %c0_i32_0 = arith.constant 0 : i32
    %c0_i32_1 = arith.constant 0 : i32
    return %c0_i32, %c0_i32_0 : i32, i32
  }
  func.func @transform_4(%arg0: i32) -> (i32, i32) {
    %c0_i32 = arith.constant 0 : i32
    %c0_i32_0 = arith.constant 0 : i32
    %c0_i32_1 = arith.constant 0 : i32
    return %c0_i32, %c0_i32_0 : i32, i32
  }
  func.func @transform_5(%arg0: i32) -> (i32, i32) {
    %c0_i32 = arith.constant 0 : i32
    %c0_i32_0 = arith.constant 0 : i32
    %c0_i32_1 = arith.constant 0 : i32
    return %c0_i32, %c0_i32_0 : i32, i32
  }
  func.func @transform_6(%arg0: i32) -> (i32, i32) {
    %c0_i32 = arith.constant 0 : i32
    %c0_i32_0 = arith.constant 0 : i32
    %c0_i32_1 = arith.constant 0 : i32
    return %c0_i32, %c0_i32_0 : i32, i32
  }
  func.func @transform_7(%arg0: i32) -> (i32, i32) {
    %c0_i32 = arith.constant 0 : i32
    %c0_i32_0 = arith.constant 0 : i32
    return %arg0, %c0_i32 : i32, i32
  }
}

</mosaic_0001>

<bundles_post_ra>
// kernel: fused_mlp_forward.1
= control target key start
LH: loop header
LB: loop body
LE: loop exit
PB: predicated region body
PF: predicated region fallthrough
CT: control target
= control target key end

     0   :  { %12 = vsyncpa [#allocation3], 0  ;;  %s3650_s0 = inlined_call_operand.hbm [shape: f32[8,32], index: 0, kind: input, shape index: {}]   ;;  %s3651_s1 = inlined_call_operand.hbm [shape: f32[32,128], index: 1, kind: input, shape index: {}]   ;;  %s3652_s2 = inlined_call_operand.vmem [shape: f32[1,128], index: 2, kind: input, shape index: {}]   ;;  %s3653_s3 = inlined_call_operand.hbm [shape: f32[128,128], index: 3, kind: input, shape index: {}]   ;;  %s3654_s4 = inlined_call_operand.vmem [shape: f32[1,128], index: 4, kind: input, shape index: {}]   ;;  %s3655_s5 = inlined_call_operand.hbm [shape: f32[128,128], index: 5, kind: input, shape index: {}]   ;;  %s3656_s6 = inlined_call_operand.vmem [shape: f32[1,128], index: 6, kind: input, shape index: {}]   ;;  %s3657_s7 = inlined_call_operand.hbm [shape: f32[8,128], index: 7, kind: output, shape index: {}]  }
   0x1   :  { %13 = vsyncpa [#allocation6], 0 }
   0x2   :  { %14 = vsyncpa [#allocation9], 0 }
   0x3   :  { %15 = vsyncpa [#allocation4], 0  ;;  %s2769_s24 = smov [#allocation5]  }
   0x4   :  { %s31_s25 = sshll.u32 %s2769_s24, 4  ;;  %s32_s25 = int_to_ptr.vmem [resolvable:$true] %s31_s25 }
   0x5   :  { %s2669_s26 = scalar_lea.vmem %s32_s25, 512  ;;  %p2674_p1 = scmp.lt.s32.totalorder %s32_s25, %s32_s25 }
   0x6   :  { %p2670_p0 = scmp.ne.s32.totalorder %s32_s25, %s2669_s26  ;;  %p2675_p2 = scmp.lt.s32.totalorder %s2669_s26, %s2669_s26 }
   0x8   :  { %p2676_p3 = por %p2675_p2, %p2674_p1 }
   0xa   :  { %p2677_p4 = pnand %p2676_p3, %p2670_p0 }
   0xc   :  { %2680 = shalt.err (!%p2677_p4)
}
   0xd   :  { %s2770_s27 = smov 128   ;;  %s2771_s28 = smov 8  }
   0xe   :  { %37 = dma.hbm_to_vmem [thread:$0]  %s3651_s1, 512, %s32_s25, [#allocation6], %s2770_s27, %s2770_s27, %s2771_s28  }
   0xf   :  { %s2772_s8 = smov [#allocation2]   ;;  %s2773_s10 = smov [#allocation7]  }
  0x10   :  { %s22_s9 = sshll.u32 %s2772_s8, 4  ;;  %s45_s11 = sshll.u32 %s2773_s10, 4  ;;  %s23_s9 = int_to_ptr.vmem [resolvable:$true] %s22_s9  ;;  %s46_s11 = int_to_ptr.vmem [resolvable:$true] %s45_s11 }
  0x11   :  { %s2689_s12 = scalar_lea.vmem %s23_s9, 128  ;;  %p2694_p6 = scmp.lt.s32.totalorder %s23_s9, %s23_s9 }
  0x12   :  { %p2690_p5 = scmp.ne.s32.totalorder %s23_s9, %s2689_s12  ;;  %p2695_p7 = scmp.lt.s32.totalorder %s2689_s12, %s2689_s12 }
  0x14   :  { %p2696_p8 = por %p2695_p7, %p2694_p6 }
  0x16   :  { %p2697_p9 = pnand %p2696_p8, %p2690_p5 }
  0x18   :  { %2700 = shalt.err (!%p2697_p9)
}
  0x19   :  { %25 = dma.hbm_to_vmem [thread:$0]  %s3650_s0, 128, %s23_s9, [#allocation3]  }
  0x1a   :  { %s2709_s15 = scalar_lea.vmem %s46_s11, 2048  ;;  %p2714_p11 = scmp.lt.s32.totalorder %s46_s11, %s46_s11 }
  0x1b   :  { %p2710_p10 = scmp.ne.s32.totalorder %s46_s11, %s2709_s15  ;;  %p2715_p12 = scmp.lt.s32.totalorder %s2709_s15, %s2709_s15 }
  0x1d   :  { %p2716_p13 = por %p2715_p12, %p2714_p11 }
  0x1f   :  { %p2717_p0 = pnand %p2716_p13, %p2710_p10 }
  0x21   :  { %2720 = shalt.err (!%p2717_p0)
}
  0x22   :  { %51 = dma.hbm_to_vmem [thread:$0]  %s3653_s3, 2048, %s46_s11, [#allocation6], %s2770_s27, %s2770_s27, %s2771_s28  }
  0x23   :  { %s2774_s17 = smov [#allocation8]  }
  0x24   :  { %s59_s18 = sshll.u32 %s2774_s17, 4  ;;  %s60_s18 = int_to_ptr.vmem [resolvable:$true] %s59_s18 }
  0x25   :  { %s2729_s19 = scalar_lea.vmem %s60_s18, 2048  ;;  %p2734_p2 = scmp.lt.s32.totalorder %s60_s18, %s60_s18 }
  0x26   :  { %p2730_p1 = scmp.ne.s32.totalorder %s60_s18, %s2729_s19  ;;  %p2735_p3 = scmp.lt.s32.totalorder %s2729_s19, %s2729_s19 }
  0x28   :  { %p2736_p4 = por %p2735_p3, %p2734_p2 }
  0x2a   :  { %p2737_p5 = pnand %p2736_p4, %p2730_p1 }
  0x2c   :  { %2740 = shalt.err (!%p2737_p5)
}
  0x2d   :  { %65 = dma.hbm_to_vmem [thread:$0]  %s3655_s5, 2048, %s60_s18, [#allocation9], %s2770_s27, %s2770_s27, %s2771_s28  }
  0x2e   :  { %2761 = dma.done.wait [#allocation3], 128  }
  0x2f   :  { %2762 = vsyncadd [#allocation3], 4294967168 }
  0x30   :  { %2763 = dma.done.wait [#allocation6], 2560  }
  0x31   :  { %2764 = vsyncadd [#allocation6], 4294964736 }
  0x32   :  { %2765 = dma.done.wait [#allocation9], 2048  }
  0x33   :  { %2766 = vsyncadd [#allocation9], 4294965248  ;;  %v2775_v0 = vmov 0.0   ;;  %vm2776_vm0 = vmmov 0   ;;  %vm92_vm1 = vcmask 261120   ;;  %v84_v1 = vld [vmem:[#allocation5 + $0x18] sm:$0xff] }
  0x34   :  { %2166 = vmatprep.subr.mxu0 %v2775_v0  ;;  %2177 = vmatprep.subr.mxu1 %v2775_v0  ;;  %v83_v2 = vld [vmem:[#allocation5 + $0x10] sm:$0xff]  ;;  %v82_v3 = vld [vmem:[#allocation5 + $0x8] sm:$0xff]  ;;  %v2845_v4 = vand.u32 4294901760, %v84_v1  ;;  %v81_v7 = vld [vmem:[#allocation5] sm:$0xff]  ;;  %s2777_s23 = smov [#allocation10]  }
  0x35   :  { %2174 = vmatprep.mubr.msk.f32.mxu0 %vm2776_vm0, %v2775_v0  ;;  %2185 = vmatprep.mubr.msk.f32.mxu1 %vm2776_vm0, %v2775_v0  ;;  %v2847_v5 = vand.u32 4294901760, %v83_v2  ;;  %v2849_v6 = vand.u32 4294901760, %v82_v3  ;;  %v80_v8 = vld [vmem:[#allocation2] sm:$0xff]  ;;  %v2851_v9 = vand.u32 4294901760, %v81_v7  ;;  %v596_v33 = vld [vmem:[#allocation7 + $0x70] sm:$0xff]  ;;  %v595_v35 = vld [vmem:[#allocation7 + $0x68] sm:$0xff] }
  0x36   :  { %v94_v10 = vsel %vm92_vm1, %v80_v8, 0  ;;  %2167 = vmatpush3.msra.mxu0 %v2845_v4  ;;  %v201_v11 = vsub.f32 %v84_v1, %v2845_v4  ;;  %v597_v32 = vld [vmem:[#allocation7 + $0x78] sm:$0xff]  ;;  %v2896_v36 = vand.u32 4294901760, %v596_v33  ;;  %v2904_v38 = vand.u32 4294901760, %v595_v35  ;;  %v594_v50 = vld [vmem:[#allocation7 + $0x60] sm:$0xff]  ;;  %v592_v55 = vld [vmem:[#allocation7 + $0x50] sm:$0xff] }
  0x37   :  { %v2855_v12 = vand.u32 4294901760, %v94_v10  ;;  %v208_v13 = vsub.f32 %v83_v2, %v2847_v5  ;;  %v2859_v14 = vsub.f32 %v82_v3, %v2849_v6  ;;  %2168 = vmatprep.subr.mxu0 %v2775_v0  ;;  %v2863_v15 = vsub.f32 %v81_v7, %v2851_v9  ;;  %v593_v52 = vld [vmem:[#allocation7 + $0x58] sm:$0xff]  ;;  %v591_v59 = vld [vmem:[#allocation7 + $0x48] sm:$0xff]  ;;  %v590_v1 = vld [vmem:[#allocation7 + $0x40] sm:$0xff]  ;;  %s1918_s24 = sshll.u32 %s2777_s23, 4  ;;  %s1919_s24 = int_to_ptr.vmem [resolvable:$true] %s1918_s24 }
  0x38   :  { %2169 = vmatpush3.msra.mxu0 %v2847_v5  ;;  %v202_v16 = vand.u32 4294901760, %v201_v11  ;;  %v2889_v34 = vand.u32 4294901760, %v597_v32  ;;  %v2910_v39 = vsub.f32 %v596_v33, %v2896_v36  ;;  %v2919_v41 = vsub.f32 %v595_v35, %v2904_v38  ;;  %v589_v7 = vld [vmem:[#allocation7 + $0x38] sm:$0xff]  ;;  %s2741_s25 = scalar_lea.vmem %s1919_s24, 128  ;;  %p2746_p7 = scmp.lt.s32.totalorder %s1919_s24, %s1919_s24 }
  0x39   :  { %v2867_v17 = vsub.f32 %v94_v10, %v2855_v12  ;;  %v209_v18 = vand.u32 4294901760, %v208_v13  ;;  %v216_v19 = vand.u32 4294901760, %v2859_v14  ;;  %2170 = vmatprep.subr.mxu0 %v2775_v0  ;;  %v223_v20 = vand.u32 4294901760, %v2863_v15  ;;  %p2742_p6 = scmp.ne.s32.totalorder %s1919_s24, %s2741_s25  ;;  %p2747_p8 = scmp.lt.s32.totalorder %s2741_s25, %s2741_s25 }
  0x3a   :  { %2171 = vmatpush3.msra.mxu0 %v2849_v6  ;;  %v203_v21 = vsub.f32 %v201_v11, %v202_v16  ;;  %v2902_v37 = vsub.f32 %v597_v32, %v2889_v34  ;;  %v706_v42 = vand.u32 4294901760, %v2910_v39  ;;  %v713_v44 = vand.u32 4294901760, %v2919_v41 }
  0x3b   :  { %v167_v22 = vand.u32 4294901760, %v2867_v17  ;;  %v210_v23 = vsub.f32 %v208_v13, %v209_v18  ;;  %v217_v24 = vsub.f32 %v2859_v14, %v216_v19  ;;  %2172 = vmatprep.subr.mxu0 %v2775_v0  ;;  %v224_v28 = vsub.f32 %v2863_v15, %v223_v20  ;;  %p2748_p9 = por %p2747_p8, %p2746_p7 }
  0x3c   :  { %2173 = vmatpush3.msra.mxu0 %v2851_v9  ;;  %v204_v25 = vand.u32 4294901760, %v203_v21  ;;  %v699_v40 = vand.u32 4294901760, %v2902_v37  ;;  %v707_v45 = vsub.f32 %v2910_v39, %v706_v42  ;;  %v714_v47 = vsub.f32 %v2919_v41, %v713_v44 }
  0x3d   :  { %v168_v26 = vsub.f32 %v2867_v17, %v167_v22  ;;  %v211_v27 = vand.u32 4294901760, %v210_v23  ;;  %2188 = vmatprep.subr.mxu0 %v2775_v0  ;;  %v218_v30 = vand.u32 4294901760, %v217_v24  ;;  %v225_v31 = vand.u32 4294901760, %v224_v28  ;;  %p2749_p10 = pnand %p2748_p9, %p2742_p6 }
  0x3e   :  { %2178 = vmatpush3.msra.mxu1 %v204_v25  ;;  %v700_v43 = vsub.f32 %v2902_v37, %v699_v40  ;;  %v708_v48 = vand.u32 4294901760, %v707_v45  ;;  %v715_v49 = vand.u32 4294901760, %v714_v47  ;;  %v2962_v51 = vand.u32 4294901760, %v594_v50  ;;  %v586_v25 = vld [vmem:[#allocation7 + $0x20] sm:$0xff] }
  0x3f   :  { %v169_v29 = vand.u32 4294901760, %v168_v26  ;;  %2179 = vmatprep.subr.mxu1 %v2775_v0  ;;  %v2967_v54 = vand.u32 4294901760, %v593_v52  ;;  %v2975_v58 = vand.u32 4294901760, %v592_v55  ;;  %v2986_v63 = vand.u32 4294901760, %v591_v59 }
  0x40   :  { %2180 = vmatpush3.msra.mxu1 %v211_v27  ;;  %v701_v46 = vand.u32 4294901760, %v700_v43  ;;  %v2965_v53 = vsub.f32 %v594_v50, %v2962_v51 }
  0x41   :  { %2175 = vmatmul.mubr.f32.vlgmr.msra.gmra.mxu0 %v169_v29  ;;  %2181 = vmatprep.subr.mxu1 %v2775_v0  ;;  %v2973_v57 = vsub.f32 %v593_v52, %v2967_v54  ;;  %v2984_v62 = vsub.f32 %v592_v55, %v2975_v58  ;;  %v3043_v29 = vand.u32 4294901760, %v586_v25  ;;  %v583_v55 = vld [vmem:[#allocation7 + $0x8] sm:$0xff] }
  0x42   :  { %2189 = vmatpush3.msra.mxu0 %v201_v11  ;;  %2182 = vmatpush3.msra.mxu1 %v218_v30  ;;  %v720_v56 = vand.u32 4294901760, %v2965_v53  ;;  %v3005_v11 = vand.u32 4294901760, %v589_v7 }
  0x43   :  { %2190 = vmatprep.subr.mxu0 %v2775_v0  ;;  %2183 = vmatprep.subr.mxu1 %v2775_v0  ;;  %v727_v61 = vand.u32 4294901760, %v2973_v57  ;;  %v3053_v43 = vsub.f32 %v586_v25, %v3043_v29 }
  0x44   :  { %2191 = vmatpush3.msra.mxu0 %v208_v13  ;;  %2184 = vmatpush3.msra.mxu1 %v225_v31  ;;  %v721_v60 = vsub.f32 %v2965_v53, %v720_v56  ;;  %v588_v13 = vld [vmem:[#allocation7 + $0x30] sm:$0xff]  ;;  %v585_v31 = vld [vmem:[#allocation7 + $0x18] sm:$0xff] }
  0x45   :  { %2192 = vmatprep.subr.mxu0 %v2775_v0  ;;  %2186 = vmatmul.mubr.f32.vlgmr.msra.gmra.mxu1 %v2855_v12  ;;  %v728_v3 = vsub.f32 %v2973_v57, %v727_v61  ;;  %v3056_v45 = vand.u32 4294901760, %v585_v31 }
  0x46   :  { %2193 = vmatpush3.msra.mxu0 %v2859_v14  ;;  %2199 = vmatprep.subr.mxu1 %v2775_v0  ;;  %v722_v2 = vand.u32 4294901760, %v721_v60 }
  0x47   :  { %2194 = vmatprep.subr.mxu0 %v2775_v0  ;;  %2200 = vmatpush3.msra.mxu1 %v2845_v4  ;;  %v729_v8 = vand.u32 4294901760, %v728_v3  ;;  %v3068_v52 = vsub.f32 %v585_v31, %v3056_v45 }
  0x48   :  { %2195 = vmatpush3.msra.mxu0 %v2863_v15  ;;  %2196 = vmatprep.mubr.msk.f32.mxu0 %vm2776_vm0, %v2775_v0 }
  0x49   :  { %2201 = vmatprep.subr.mxu1 %v2775_v0  ;;  %2210 = vmatprep.subr.mxu0 %v2775_v0  ;;  %v3661_v3 = vand.u32 4294901760, %v3068_v52 }
  0x4a   :  { %2197 = vmatmul.mubr.f32.vlgmr.msra.gmra.mxu0 %v2867_v17  ;;  %2202 = vmatpush3.msra.mxu1 %v2847_v5  ;;  %v3018_v17 = vand.u32 4294901760, %v588_v13 }
  0x4b   :  { %2211 = vmatpush3.msra.mxu0 %v202_v16  ;;  %2203 = vmatprep.subr.mxu1 %v2775_v0  ;;  %v3016_v16 = vsub.f32 %v589_v7, %v3005_v11  ;;  %v582_v7 = vld [vmem:[#allocation7] sm:$0xff] }
  0x4c   :  { %2212 = vmatprep.subr.mxu0 %v2775_v0  ;;  %2204 = vmatpush3.msra.mxu1 %v2849_v6 }
  0x4d   :  { %2213 = vmatpush3.msra.mxu0 %v209_v18  ;;  %2205 = vmatprep.subr.mxu1 %v2775_v0  ;;  %v755_v21 = vand.u32 4294901760, %v3016_v16 }
  0x4e   :  { %2214 = vmatprep.subr.mxu0 %v2775_v0  ;;  %2206 = vmatpush3.msra.mxu1 %v2851_v9 }
  0x4f   :  { %2207 = vmatprep.mubr.msk.f32.mxu1 %vm2776_vm0, %v2775_v0  ;;  %2215 = vmatpush3.msra.mxu0 %v216_v19  ;;  %v587_v19 = vld [vmem:[#allocation7 + $0x28] sm:$0xff]  ;;  %v756_v26 = vsub.f32 %v3016_v16, %v755_v21 }
  0x50   :  { %2208 = vmatmul.mubr.f32.vlgmr.msra.gmra.mxu1 %v167_v22  ;;  %2216 = vmatprep.subr.mxu0 %v2775_v0  ;;  %v3026_v22 = vsub.f32 %v588_v13, %v3018_v17  ;;  %v3028_v23 = vand.u32 4294901760, %v587_v19 }
  0x51   :  { %2221 = vmatprep.subr.mxu1 %v2775_v0  ;;  %2217 = vmatpush3.msra.mxu0 %v223_v20  ;;  %v757_v32 = vand.u32 4294901760, %v756_v26 }
  0x52   :  { %2218 = vmatprep.mubr.msk.f32.mxu0 %vm2776_vm0, %v2775_v0  ;;  %2222 = vmatpush3.msra.mxu1 %v2845_v4  ;;  %v734_v4 = vand.u32 4294901760, %v2984_v62  ;;  %v762_v27 = vand.u32 4294901760, %v3026_v22  ;;  %v3041_v28 = vsub.f32 %v587_v19, %v3028_v23 }
  0x53   :  { %2219 = vmatmul.mubr.f32.vlgmr.msra.gmra.mxu0 %v2855_v12  ;;  %2223 = vmatprep.subr.mxu1 %v2775_v0 }
  0x54   :  { %2229 = vmatprep.mubr.msk.f32.mxu1 %vm2776_vm0, %v2775_v0  ;;  %2224 = vmatpush3.msra.mxu1 %v2847_v5  ;;  %v2995_v5 = vsub.f32 %v591_v59, %v2986_v63  ;;  %v763_v33 = vsub.f32 %v3026_v22, %v762_v27  ;;  %v3663_v35 = vand.u32 4294901760, %v3041_v28 }
  0x55   :  { %2232 = vmatprep.subr.mxu0 %v2775_v0  ;;  %2225 = vmatprep.subr.mxu1 %v2775_v0 }
  0x56   :  { %2233 = vmatpush3.msra.mxu0 %v2889_v34  ;;  %2226 = vmatpush3.msra.mxu1 %v2849_v6  ;;  %v2998_v6 = vand.u32 4294901760, %v590_v1  ;;  %v741_v10 = vand.u32 4294901760, %v2995_v5  ;;  %v764_v47 = vand.u32 4294901760, %v763_v33 }
  0x57   :  { %2234 = vmatprep.subr.mxu0 %v2775_v0  ;;  %2227 = vmatprep.subr.mxu1 %v2775_v0 }
  0x58   :  { %2235 = vmatpush3.msra.mxu0 %v2896_v36  ;;  %2228 = vmatpush3.msra.mxu1 %v2851_v9  ;;  %v735_v9 = vsub.f32 %v2984_v62, %v734_v4  ;;  %v742_v15 = vsub.f32 %v2995_v5, %v741_v10 }
  0x59   :  { %2236 = vmatprep.subr.mxu0 %v2775_v0  ;;  %2230 = vmatmul.mubr.f32.vlgmr.msra.gmra.mxu1 %v2855_v12  ;;  %v3009_v12 = vsub.f32 %v590_v1, %v2998_v6 }
  0x5a   :  { %2267 = vmatprep.subr.mxu1 %v2775_v0  ;;  %2237 = vmatpush3.msra.mxu0 %v2904_v38  ;;  %v736_v14 = vand.u32 4294901760, %v735_v9  ;;  %v743_v20 = vand.u32 4294901760, %v742_v15  ;;  %v784_v15 = vsub.f32 %v3068_v52, %v3661_v3 }
  0x5b   :  { %2268 = vmatpush3.msra.mxu1 %v701_v46  ;;  %2238 = vmatprep.subr.mxu0 %v2775_v0  ;;  %v748_v18 = vand.u32 4294901760, %v3009_v12  ;;  %v584_v46 = vld [vmem:[#allocation7 + $0x10] sm:$0xff] }
  0x5c   :  { %2269 = vmatprep.subr.mxu1 %v2775_v0  ;;  %2299 = vmatprep.mubr.msk.f32.mxu1 %vm2776_vm0, %v2775_v0  ;;  %v3064_v50 = vand.u32 4294901760, %v584_v46  ;;  %v785_v25 = vand.u32 4294901760, %v784_v15 }
  0x5d   :  { %2270 = vmatpush3.msra.mxu1 %v708_v48  ;;  %2264 = vmatprep.mubr.msk.f32.mxu0 %vm2776_vm0, %v2775_v0  ;;  %v749_v24 = vsub.f32 %v3009_v12, %v748_v18  ;;  %v770_v48 = vsub.f32 %v3041_v28, %v3663_v35 }
  0x5e   :  { %2271 = vmatprep.subr.mxu1 %v2775_v0  ;;  %2239 = vmatpush3.msra.mxu0 %v2962_v51  ;;  %v3076_v1 = vsub.f32 %v584_v46, %v3064_v50 }
  0x5f   :  { %2272 = vmatpush3.msra.mxu1 %v715_v49  ;;  %2240 = vmatprep.subr.mxu0 %v2775_v0  ;;  %v750_v30 = vand.u32 4294901760, %v749_v24  ;;  %v3662_v49 = vand.u32 4294901760, %v3053_v43  ;;  %v771_v59 = vand.u32 4294901760, %v770_v48 }
  0x60   :  { %2273 = vmatprep.subr.mxu1 %v2775_v0  ;;  %2241 = vmatpush3.msra.mxu0 %v2967_v54  ;;  %v3660_v9 = vand.u32 4294901760, %v3076_v1 }
  0x61   :  { %2242 = vmatprep.subr.mxu0 %v2775_v0  ;;  %2274 = vmatpush3.msra.mxu1 %v722_v2  ;;  %v777_v60 = vsub.f32 %v3053_v43, %v3662_v49  ;;  %v3078_v2 = vand.u32 4294901760, %v583_v55 }
  0x62   :  { %2243 = vmatpush3.msra.mxu0 %v2975_v58  ;;  %2275 = vmatprep.subr.mxu1 %v2775_v0  ;;  %v791_v19 = vsub.f32 %v3076_v1, %v3660_v9 }
  0x63   :  { %2244 = vmatprep.subr.mxu0 %v2775_v0  ;;  %2276 = vmatpush3.msra.mxu1 %v729_v8  ;;  %v778_v8 = vand.u32 4294901760, %v777_v60  ;;  %v3086_v13 = vsub.f32 %v583_v55, %v3078_v2 }
  0x64   :  { %2245 = vmatpush3.msra.mxu0 %v2986_v63  ;;  %2277 = vmatprep.subr.mxu1 %v2775_v0  ;;  %v792_v26 = vand.u32 4294901760, %v791_v19 }
  0x65   :  { %2246 = vmatprep.subr.mxu0 %v2775_v0  ;;  %2278 = vmatpush3.msra.mxu1 %v736_v14  ;;  %v3088_v14 = vand.u32 4294901760, %v582_v7 }
  0x66   :  { %2247 = vmatpush3.msra.mxu0 %v2998_v6  ;;  %2279 = vmatprep.subr.mxu1 %v2775_v0 }
  0x67   :  { %2248 = vmatprep.subr.mxu0 %v2775_v0  ;;  %2280 = vmatpush3.msra.mxu1 %v743_v20  ;;  %v3659_v20 = vand.u32 4294901760, %v3086_v13  ;;  %v3101_v24 = vsub.f32 %v582_v7, %v3088_v14 }
  0x68   :  { %2249 = vmatpush3.msra.mxu0 %v3005_v11  ;;  %2281 = vmatprep.subr.mxu1 %v2775_v0 }
  0x69   :  { %2250 = vmatprep.subr.mxu0 %v2775_v0  ;;  %2282 = vmatpush3.msra.mxu1 %v750_v30  ;;  %v798_v30 = vsub.f32 %v3086_v13, %v3659_v20  ;;  %v3658_v31 = vand.u32 4294901760, %v3101_v24 }
  0x6a   :  { %2251 = vmatpush3.msra.mxu0 %v3018_v17  ;;  %2283 = vmatprep.subr.mxu1 %v2775_v0 }
  0x6b   :  { %2252 = vmatprep.subr.mxu0 %v2775_v0  ;;  %2284 = vmatpush3.msra.mxu1 %v757_v32  ;;  %v799_v32 = vand.u32 4294901760, %v798_v30  ;;  %v805_v33 = vsub.f32 %v3101_v24, %v3658_v31 }
  0x6c   :  { %2253 = vmatpush3.msra.mxu0 %v3028_v23  ;;  %2285 = vmatprep.subr.mxu1 %v2775_v0 }
  0x6d   :  { %2254 = vmatprep.subr.mxu0 %v2775_v0  ;;  %2286 = vmatpush3.msra.mxu1 %v764_v47  ;;  %v806_v46 = vand.u32 4294901760, %v805_v33 }
  0x6e   :  { %2255 = vmatpush3.msra.mxu0 %v3043_v29  ;;  %2287 = vmatprep.subr.mxu1 %v2775_v0 }
  0x6f   :  { %2256 = vmatprep.subr.mxu0 %v2775_v0  ;;  %2288 = vmatpush3.msra.mxu1 %v771_v59  ;;  %v1929_v59 = vld [vmem:[%s3652_s2] ss:$0 sm:$0xff] }
  0x70   :  { %2257 = vmatpush3.msra.mxu0 %v3056_v45  ;;  %2289 = vmatprep.subr.mxu1 %v2775_v0 }
  0x71   :  { %2258 = vmatprep.subr.mxu0 %v2775_v0  ;;  %2290 = vmatpush3.msra.mxu1 %v778_v8 }
  0x72   :  { %2259 = vmatpush3.msra.mxu0 %v3064_v50  ;;  %2291 = vmatprep.subr.mxu1 %v2775_v0 }
  0x73   :  { %2260 = vmatprep.subr.mxu0 %v2775_v0  ;;  %2292 = vmatpush3.msra.mxu1 %v785_v25 }
  0x74   :  { %2261 = vmatpush3.msra.mxu0 %v3078_v2  ;;  %2293 = vmatprep.subr.mxu1 %v2775_v0 }
  0x75   :  { %2262 = vmatprep.subr.mxu0 %v2775_v0  ;;  %2294 = vmatpush3.msra.mxu1 %v792_v26 }
  0x76   :  { %2263 = vmatpush3.msra.mxu0 %v3088_v14  ;;  %2295 = vmatprep.subr.mxu1 %v2775_v0 }
  0x77   :  { %2302 = vmatprep.subr.mxu0 %v2775_v0  ;;  %2296 = vmatpush3.msra.mxu1 %v799_v32 }
  0x78   :  { %2297 = vmatprep.subr.mxu1 %v2775_v0 }
  0x79   :  { %2298 = vmatpush3.msra.mxu1 %v806_v46 }
  0x7a   :  { %2337 = vmatprep.subr.mxu1 %v2775_v0 }
 0x101   :  { %v171_v47 = vpop.f32.mrf.mxu0 }
 0x102   :  { %v172_v8 = vadd.f32 %v1929_v59, %v171_v47 }
 0x103   :  { %v2176_v48 = vpop.f32.mrf.mxu0 }
 0x105   :  { %v262_v55 = vpop.f32.mrf.mxu1 }
 0x106   :  { %v263_v19 = vadd.f32 %v262_v55, %v172_v8  ;;  %v1254_v8 = vld [vmem:[#allocation8 + $0x38] sm:$0xff] }
 0x107   :  { %v2187_v60 = vpop.f32.mrf.mxu1 }
 0x10a   :  { %v342_v7 = vpop.f32.mrf.mxu0 }
 0x10b   :  { %v343_v30 = vadd.f32 %v342_v7, %v263_v19 }
 0x10c   :  { %v2198_v15 = vpop.f32.mrf.mxu0 }
 0x110   :  { %v419_v25 = vpop.f32.mrf.mxu1 }
 0x111   :  { %v420_v33 = vadd.f32 %v419_v25, %v343_v30  ;;  %v3377_v25 = vand.u32 4294901760, %v1254_v8 }
 0x112   :  { %v2209_v26 = vpop.f32.mrf.mxu1 }
 0x113   :  { %v502_v32 = vpop.f32.mrf.mxu0  ;;  %v1253_v26 = vld [vmem:[#allocation8 + $0x30] sm:$0xff] }
 0x114   :  { %v503_v31 = vadd.f32 %v502_v32, %v420_v33  ;;  %v3383_v32 = vsub.f32 %v1254_v8, %v3377_v25  ;;  %v3385_v33 = vand.u32 4294901760, %v1253_v26 }
 0x115   :  { %v2220_v46 = vpop.f32.mrf.mxu0 }
 0x116   :  { %v1252_v46 = vld [vmem:[#allocation8 + $0x28] sm:$0xff] }
 0x119   :  { %v577_v20 = vpop.f32.mrf.mxu1 }
 0x11a   :  { %v578_v9 = vadd.f32 %v577_v20, %v503_v31 }
 0x11b   :  { %v2231_v48 = vpop.f32.mrf.mxu1 }
 0x11c   :  { %v581_v3 = vmax.f32 %v578_v9, 0.0 }
 0x11e   :  { %v3121_v49 = vand.u32 4294901760, %v581_v3 }
 0x120   :  { %v3124_v35 = vsub.f32 %v581_v3, %v3121_v49  ;;  %2300 = vmatmul.mubr.f32.vlgmr.msra.gmra.mxu1 %v3121_v49 }
 0x121   :  { %2338 = vmatpush3.msra.mxu1 %v2889_v34  ;;  %2369 = vmatprep.mubr.msk.f32.mxu1 %vm2776_vm0, %v2775_v0 }
 0x122   :  { %v688_v47 = vand.u32 4294901760, %v3124_v35  ;;  %2339 = vmatprep.subr.mxu1 %v2775_v0 }
 0x123   :  { %2340 = vmatpush3.msra.mxu1 %v2896_v36 }
 0x124   :  { %v689_v9 = vsub.f32 %v3124_v35, %v688_v47  ;;  %2341 = vmatprep.subr.mxu1 %v2775_v0 }
 0x125   :  { %2342 = vmatpush3.msra.mxu1 %v2904_v38 }
 0x126   :  { %2343 = vmatprep.subr.mxu1 %v2775_v0  ;;  %v690_v3 = vand.u32 4294901760, %v689_v9  ;;  %v3392_v9 = vsub.f32 %v1253_v26, %v3385_v33 }
 0x127   :  { %2344 = vmatpush3.msra.mxu1 %v2962_v51 }
 0x128   :  { %2345 = vmatprep.subr.mxu1 %v2775_v0  ;;  %2265 = vmatmul.mubr.f32.vlgmr.msra.gmra.mxu0 %v690_v3  ;;  %v3394_v3 = vand.u32 4294901760, %v1252_v46 }
 0x129   :  { %2303 = vmatpush3.msra.mxu0 %v2902_v37  ;;  %2346 = vmatpush3.msra.mxu1 %v2967_v54  ;;  %v3670_v37 = vand.u32 4294901760, %v3068_v52 }
 0x12a   :  { %2304 = vmatprep.subr.mxu0 %v2775_v0  ;;  %2347 = vmatprep.subr.mxu1 %v2775_v0 }
 0x12b   :  { %2305 = vmatpush3.msra.mxu0 %v2910_v39  ;;  %2348 = vmatpush3.msra.mxu1 %v2975_v58  ;;  %v3672_v39 = vand.u32 4294901760, %v3086_v13 }
 0x12c   :  { %2306 = vmatprep.subr.mxu0 %v2775_v0  ;;  %2349 = vmatprep.subr.mxu1 %v2775_v0 }
 0x12d   :  { %2307 = vmatpush3.msra.mxu0 %v2919_v41  ;;  %2350 = vmatpush3.msra.mxu1 %v2986_v63  ;;  %v1262_v41 = vld [vmem:[#allocation8 + $0x78] sm:$0xff] }
 0x12e   :  { %2308 = vmatprep.subr.mxu0 %v2775_v0  ;;  %2351 = vmatprep.subr.mxu1 %v2775_v0 }
 0x12f   :  { %2309 = vmatpush3.msra.mxu0 %v2965_v53  ;;  %2352 = vmatpush3.msra.mxu1 %v2998_v6 }
 0x130   :  { %2310 = vmatprep.subr.mxu0 %v2775_v0  ;;  %2353 = vmatprep.subr.mxu1 %v2775_v0 }
 0x131   :  { %2311 = vmatpush3.msra.mxu0 %v2973_v57  ;;  %2354 = vmatpush3.msra.mxu1 %v3005_v11  ;;  %v1258_v57 = vld [vmem:[#allocation8 + $0x58] sm:$0xff] }
 0x132   :  { %2312 = vmatprep.subr.mxu0 %v2775_v0  ;;  %2355 = vmatprep.subr.mxu1 %v2775_v0 }
 0x133   :  { %2313 = vmatpush3.msra.mxu0 %v2984_v62  ;;  %2356 = vmatpush3.msra.mxu1 %v3018_v17  ;;  %v3300_v62 = vand.u32 4294901760, %v1258_v57 }
 0x134   :  { %2314 = vmatprep.subr.mxu0 %v2775_v0  ;;  %2357 = vmatprep.subr.mxu1 %v2775_v0 }
 0x135   :  { %2315 = vmatpush3.msra.mxu0 %v2995_v5  ;;  %2358 = vmatpush3.msra.mxu1 %v3028_v23  ;;  %v1255_v5 = vld [vmem:[#allocation8 + $0x40] sm:$0xff] }
 0x136   :  { %2316 = vmatprep.subr.mxu0 %v2775_v0  ;;  %2359 = vmatprep.subr.mxu1 %v2775_v0 }
 0x137   :  { %2317 = vmatpush3.msra.mxu0 %v3009_v12  ;;  %2360 = vmatpush3.msra.mxu1 %v3043_v29 }
 0x138   :  { %2318 = vmatprep.subr.mxu0 %v2775_v0  ;;  %2361 = vmatprep.subr.mxu1 %v2775_v0 }
 0x139   :  { %2319 = vmatpush3.msra.mxu0 %v3016_v16  ;;  %2362 = vmatpush3.msra.mxu1 %v3056_v45 }
 0x13a   :  { %2320 = vmatprep.subr.mxu0 %v2775_v0  ;;  %2363 = vmatprep.subr.mxu1 %v2775_v0 }
 0x13b   :  { %2321 = vmatpush3.msra.mxu0 %v3026_v22  ;;  %2364 = vmatpush3.msra.mxu1 %v3064_v50 }
 0x13c   :  { %2322 = vmatprep.subr.mxu0 %v2775_v0  ;;  %2365 = vmatprep.subr.mxu1 %v2775_v0 }
 0x13d   :  { %2323 = vmatpush3.msra.mxu0 %v3041_v28  ;;  %2366 = vmatpush3.msra.mxu1 %v3078_v2 }
 0x13e   :  { %2324 = vmatprep.subr.mxu0 %v2775_v0  ;;  %2367 = vmatprep.subr.mxu1 %v2775_v0 }
 0x13f   :  { %2325 = vmatpush3.msra.mxu0 %v3053_v43  ;;  %2368 = vmatpush3.msra.mxu1 %v3088_v14 }
 0x140   :  { %2326 = vmatprep.subr.mxu0 %v2775_v0  ;;  %2370 = vmatmul.mubr.f32.vlgmr.msra.gmra.mxu1 %v688_v47  ;;  %v1420_v47 = vand.u32 4294901760, %v3383_v32 }
 0x141   :  { %2407 = vmatprep.subr.mxu1 %v2775_v0  ;;  %2327 = vmatpush3.msra.mxu0 %v3068_v52 }
 0x142   :  { %2408 = vmatpush3.msra.mxu1 %v2889_v34  ;;  %2328 = vmatprep.subr.mxu0 %v2775_v0  ;;  %v3668_v34 = vand.u32 4294901760, %v3041_v28 }
 0x143   :  { %2409 = vmatprep.subr.mxu1 %v2775_v0  ;;  %2329 = vmatpush3.msra.mxu0 %v3076_v1 }
 0x144   :  { %2410 = vmatpush3.msra.mxu1 %v2896_v36  ;;  %2330 = vmatprep.subr.mxu0 %v2775_v0  ;;  %v3669_v36 = vand.u32 4294901760, %v3053_v43 }
 0x145   :  { %2411 = vmatprep.subr.mxu1 %v2775_v0  ;;  %2331 = vmatpush3.msra.mxu0 %v3086_v13 }
 0x146   :  { %2412 = vmatpush3.msra.mxu1 %v2904_v38  ;;  %2332 = vmatprep.subr.mxu0 %v2775_v0  ;;  %v3671_v38 = vand.u32 4294901760, %v3076_v1 }
 0x147   :  { %2413 = vmatprep.subr.mxu1 %v2775_v0  ;;  %2333 = vmatpush3.msra.mxu0 %v3101_v24 }
 0x148   :  { %2334 = vmatprep.mubr.msk.f32.mxu0 %vm2776_vm0, %v2775_v0  ;;  %2414 = vmatpush3.msra.mxu1 %v2962_v51 }
 0x149   :  { %2335 = vmatmul.mubr.f32.vlgmr.msra.gmra.mxu0 %v3124_v35  ;;  %2372 = vmatprep.subr.mxu0 %v2775_v0 }
 0x14a   :  { %2415 = vmatprep.subr.mxu1 %v2775_v0  ;;  %2373 = vmatpush3.msra.mxu0 %v699_v40  ;;  %v3673_v40 = vand.u32 4294901760, %v3101_v24 }
 0x14b   :  { %2416 = vmatpush3.msra.mxu1 %v2967_v54  ;;  %2374 = vmatprep.subr.mxu0 %v2775_v0  ;;  %v1260_v54 = vld [vmem:[#allocation8 + $0x68] sm:$0xff] }
 0x14c   :  { %2417 = vmatprep.subr.mxu1 %v2775_v0  ;;  %2375 = vmatpush3.msra.mxu0 %v706_v42  ;;  %v3288_v42 = vand.u32 4294901760, %v1262_v41 }
 0x14d   :  { %2418 = vmatpush3.msra.mxu1 %v2975_v58  ;;  %2376 = vmatprep.subr.mxu0 %v2775_v0  ;;  %v3296_v58 = vand.u32 4294901760, %v1260_v54 }
 0x14e   :  { %2419 = vmatprep.subr.mxu1 %v2775_v0  ;;  %2377 = vmatpush3.msra.mxu0 %v713_v44  ;;  %v1261_v44 = vld [vmem:[#allocation8 + $0x70] sm:$0xff]  ;;  %v3291_v51 = vsub.f32 %v1262_v41, %v3288_v42 }
 0x14f   :  { %2420 = vmatpush3.msra.mxu1 %v2986_v63  ;;  %2378 = vmatprep.subr.mxu0 %v2775_v0  ;;  %v3293_v53 = vand.u32 4294901760, %v1261_v44  ;;  %v1257_v63 = vld [vmem:[#allocation8 + $0x50] sm:$0xff]  ;;  %v3313_v16 = vsub.f32 %v1260_v54, %v3296_v58 }
 0x150   :  { %2421 = vmatprep.subr.mxu1 %v2775_v0  ;;  %2379 = vmatpush3.msra.mxu0 %v720_v56  ;;  %v1259_v56 = vld [vmem:[#allocation8 + $0x60] sm:$0xff] }
 0x151   :  { %2422 = vmatpush3.msra.mxu1 %v2998_v6  ;;  %2380 = vmatprep.subr.mxu0 %v2775_v0  ;;  %v1364_v6 = vand.u32 4294901760, %v3291_v51 }
 0x152   :  { %2423 = vmatprep.subr.mxu1 %v2775_v0  ;;  %2381 = vmatpush3.msra.mxu0 %v727_v61  ;;  %v3298_v61 = vand.u32 4294901760, %v1259_v56 }
 0x153   :  { %2424 = vmatpush3.msra.mxu1 %v3005_v11  ;;  %2382 = vmatprep.subr.mxu0 %v2775_v0  ;;  %v3308_v11 = vand.u32 4294901760, %v1257_v63  ;;  %v1365_v22 = vsub.f32 %v3291_v51, %v1364_v6 }
 0x154   :  { %2425 = vmatprep.subr.mxu1 %v2775_v0  ;;  %2383 = vmatpush3.msra.mxu0 %v734_v4  ;;  %v1256_v4 = vld [vmem:[#allocation8 + $0x48] sm:$0xff] }
 0x155   :  { %2426 = vmatpush3.msra.mxu1 %v3018_v17  ;;  %2384 = vmatprep.subr.mxu0 %v2775_v0  ;;  %v3310_v12 = vand.u32 4294901760, %v1256_v4  ;;  %v3316_v17 = vsub.f32 %v1259_v56, %v3298_v61 }
 0x156   :  { %2427 = vmatprep.subr.mxu1 %v2775_v0  ;;  %2385 = vmatpush3.msra.mxu0 %v741_v10  ;;  %v3305_v10 = vsub.f32 %v1261_v44, %v3293_v53 }
 0x157   :  { %2428 = vmatpush3.msra.mxu1 %v3028_v23  ;;  %2386 = vmatprep.subr.mxu0 %v2775_v0  ;;  %v3333_v28 = vsub.f32 %v1256_v4, %v3310_v12  ;;  %v1385_v35 = vand.u32 4294901760, %v3316_v17 }
 0x158   :  { %2429 = vmatprep.subr.mxu1 %v2775_v0  ;;  %2387 = vmatpush3.msra.mxu0 %v748_v18  ;;  %v3319_v18 = vsub.f32 %v1258_v57, %v3300_v62  ;;  %v1371_v23 = vand.u32 4294901760, %v3305_v10 }
 0x159   :  { %2430 = vmatpush3.msra.mxu1 %v3043_v29  ;;  %2388 = vmatprep.subr.mxu0 %v2775_v0  ;;  %v1378_v29 = vand.u32 4294901760, %v3313_v16  ;;  %v1406_v20 = vand.u32 4294901760, %v3333_v28 }
 0x15a   :  { %2431 = vmatprep.subr.mxu1 %v2775_v0  ;;  %2389 = vmatpush3.msra.mxu0 %v755_v21  ;;  %v3322_v21 = vand.u32 4294901760, %v1255_v5  ;;  %v1392_v43 = vand.u32 4294901760, %v3319_v18 }
 0x15b   :  { %2432 = vmatpush3.msra.mxu1 %v3056_v45  ;;  %2390 = vmatprep.subr.mxu0 %v2775_v0  ;;  %v1366_v45 = vand.u32 4294901760, %v1365_v22  ;;  %v1379_v1 = vsub.f32 %v3313_v16, %v1378_v29  ;;  %v1407_v7 = vsub.f32 %v3333_v28, %v1406_v20 }
 0x15c   :  { %2433 = vmatprep.subr.mxu1 %v2775_v0  ;;  %2391 = vmatpush3.msra.mxu0 %v762_v27  ;;  %v3329_v27 = vsub.f32 %v1257_v63, %v3308_v11  ;;  %v3345_v52 = vsub.f32 %v1255_v5, %v3322_v21  ;;  %v1249_v63 = vld [vmem:[#allocation8 + $0x10] sm:$0xff] }
 0x15d   :  { %2434 = vmatpush3.msra.mxu1 %v3064_v50  ;;  %2392 = vmatprep.subr.mxu0 %v2775_v0  ;;  %v1380_v24 = vand.u32 4294901760, %v1379_v1  ;;  %v1408_v30 = vand.u32 4294901760, %v1407_v7  ;;  %v1248_v1 = vld [vmem:[#allocation8 + $0x8] sm:$0xff] }
 0x15e   :  { %2435 = vmatprep.subr.mxu1 %v2775_v0  ;;  %2393 = vmatpush3.msra.mxu0 %v3668_v34  ;;  %v1399_v50 = vand.u32 4294901760, %v3329_v27  ;;  %v1413_v59 = vand.u32 4294901760, %v3345_v52  ;;  %v1251_v34 = vld [vmem:[#allocation8 + $0x20] sm:$0xff] }
 0x15f   :  { %2436 = vmatpush3.msra.mxu1 %v3078_v2  ;;  %2394 = vmatprep.subr.mxu0 %v2775_v0  ;;  %v1386_v2 = vsub.f32 %v3316_v17, %v1385_v35 }
 0x160   :  { %2437 = vmatprep.subr.mxu1 %v2775_v0  ;;  %2395 = vmatpush3.msra.mxu0 %v3669_v36  ;;  %v1400_v55 = vsub.f32 %v3329_v27, %v1399_v50  ;;  %v1414_v19 = vsub.f32 %v3345_v52, %v1413_v59  ;;  %v1421_v36 = vsub.f32 %v3383_v32, %v1420_v47 }
 0x161   :  { %2438 = vmatpush3.msra.mxu1 %v3088_v14  ;;  %2439 = vmatprep.mubr.msk.f32.mxu1 %vm2776_vm0, %v2775_v0  ;;  %v1393_v14 = vsub.f32 %v3319_v18, %v1392_v43  ;;  %v1387_v31 = vand.u32 4294901760, %v1386_v2 }
 0x162   :  { %2396 = vmatprep.subr.mxu0 %v2775_v0  ;;  %2440 = vmatmul.mubr.f32.vlgmr.msra.gmra.mxu1 %v3121_v49  ;;  %v1401_v15 = vand.u32 4294901760, %v1400_v55  ;;  %v1415_v48 = vand.u32 4294901760, %v1414_v19  ;;  %v1422_v41 = vand.u32 4294901760, %v1421_v36  ;;  %v1247_v55 = vld [vmem:[#allocation8] sm:$0xff] }
 0x163   :  { %2397 = vmatpush3.msra.mxu0 %v3670_v37  ;;  %2404 = vmatprep.mubr.msk.f32.mxu0 %vm2776_vm0, %v2775_v0  ;;  %v1394_v60 = vand.u32 4294901760, %v1393_v14  ;;  %v1427_v37 = vand.u32 4294901760, %v3392_v9 }
 0x164   :  { %2398 = vmatprep.subr.mxu0 %v2775_v0  ;;  %2477 = vmatprep.subr.mxu1 %v2775_v0 }
 0x165   :  { %2399 = vmatpush3.msra.mxu0 %v3671_v38  ;;  %2509 = vmatprep.mubr.msk.f32.mxu1 %vm2776_vm0, %v2775_v0  ;;  %v3404_v38 = vsub.f32 %v1252_v46, %v3394_v3  ;;  %v1428_v44 = vsub.f32 %v3392_v9, %v1427_v37 }
 0x166   :  { %2400 = vmatprep.subr.mxu0 %v2775_v0  ;;  %2478 = vmatpush3.msra.mxu1 %v1366_v45  ;;  %v3427_v45 = vand.u32 4294901760, %v1249_v63 }
 0x167   :  { %2401 = vmatpush3.msra.mxu0 %v3672_v39  ;;  %2479 = vmatprep.subr.mxu1 %v2775_v0  ;;  %v3406_v39 = vand.u32 4294901760, %v1251_v34  ;;  %v1434_v54 = vand.u32 4294901760, %v3404_v38  ;;  %v1429_v4 = vand.u32 4294901760, %v1428_v44 }
 0x168   :  { %2402 = vmatprep.subr.mxu0 %v2775_v0  ;;  %v3438_v14 = vsub.f32 %v1249_v63, %v3427_v45 }
 0x169   :  { %2403 = vmatpush3.msra.mxu0 %v3673_v40  ;;  %v1250_v40 = vld [vmem:[#allocation8 + $0x18] sm:$0xff]  ;;  %v3416_v56 = vsub.f32 %v1251_v34, %v3406_v39  ;;  %v1435_v5 = vsub.f32 %v3404_v38, %v1434_v54 }
 0x16a   :  { %2405 = vmatmul.mubr.f32.vlgmr.msra.gmra.mxu0 %v3121_v49  ;;  %2442 = vmatprep.subr.mxu0 %v2775_v0  ;;  %v1372_v49 = vsub.f32 %v3305_v10, %v1371_v23  ;;  %v3420_v57 = vand.u32 4294901760, %v1250_v40  ;;  %v3666_v7 = vand.u32 4294901760, %v3438_v14 }
 0x16b   :  { %2474 = vmatprep.mubr.msk.f32.mxu0 %vm2776_vm0, %v2775_v0  ;;  %2443 = vmatpush3.msra.mxu0 %v3288_v42  ;;  %v1441_v22 = vand.u32 4294901760, %v3416_v56  ;;  %v1436_v2 = vand.u32 4294901760, %v1435_v5 }
 0x16c   :  { %2444 = vmatprep.subr.mxu0 %v2775_v0  ;;  %v1373_v13 = vand.u32 4294901760, %v1372_v49  ;;  %v3431_v49 = vsub.f32 %v1250_v40, %v3420_v57  ;;  %v1456_v26 = vsub.f32 %v3438_v14, %v3666_v7 }
 0x16d   :  { %2445 = vmatpush3.msra.mxu0 %v3293_v53 }
 0x16e   :  { %2446 = vmatprep.subr.mxu0 %v2775_v0  ;;  %2480 = vmatpush3.msra.mxu1 %v1373_v13  ;;  %v1442_v13 = vsub.f32 %v3416_v56, %v1441_v22  ;;  %v1457_v34 = vand.u32 4294901760, %v1456_v26  ;;  %v1930_v26 = vld [vmem:[%s3654_s4] ss:$0 sm:$0xff] }
 0x16f   :  { %2447 = vmatpush3.msra.mxu0 %v3296_v58  ;;  %2481 = vmatprep.subr.mxu1 %v2775_v0 }
 0x170   :  { %2448 = vmatprep.subr.mxu0 %v2775_v0  ;;  %2482 = vmatpush3.msra.mxu1 %v1380_v24  ;;  %v3440_v24 = vand.u32 4294901760, %v1248_v1 }
 0x171   :  { %2449 = vmatpush3.msra.mxu0 %v3298_v61  ;;  %2483 = vmatprep.subr.mxu1 %v2775_v0 }
 0x172   :  { %2450 = vmatprep.subr.mxu0 %v2775_v0  ;;  %2484 = vmatpush3.msra.mxu1 %v1387_v31  ;;  %v3667_v31 = vand.u32 4294901760, %v3431_v49  ;;  %v3448_v8 = vsub.f32 %v1248_v1, %v3440_v24 }
 0x173   :  { %2451 = vmatpush3.msra.mxu0 %v3300_v62  ;;  %2485 = vmatprep.subr.mxu1 %v2775_v0 }
 0x174   :  { %2452 = vmatprep.subr.mxu0 %v2775_v0  ;;  %2486 = vmatpush3.msra.mxu1 %v1394_v60  ;;  %v1443_v60 = vand.u32 4294901760, %v1442_v13  ;;  %v1449_v19 = vsub.f32 %v3431_v49, %v3667_v31 }
 0x175   :  { %2453 = vmatpush3.msra.mxu0 %v3308_v11  ;;  %2487 = vmatprep.subr.mxu1 %v2775_v0 }
 0x176   :  { %2454 = vmatprep.subr.mxu0 %v2775_v0  ;;  %2488 = vmatpush3.msra.mxu1 %v1401_v15  ;;  %v3450_v15 = vand.u32 4294901760, %v1247_v55 }
 0x177   :  { %2455 = vmatpush3.msra.mxu0 %v3310_v12  ;;  %2489 = vmatprep.subr.mxu1 %v2775_v0 }
 0x178   :  { %2456 = vmatprep.subr.mxu0 %v2775_v0  ;;  %2490 = vmatpush3.msra.mxu1 %v1408_v30  ;;  %v3665_v30 = vand.u32 4294901760, %v3448_v8  ;;  %v3463_v46 = vsub.f32 %v1247_v55, %v3450_v15 }
 0x179   :  { %2457 = vmatpush3.msra.mxu0 %v3322_v21  ;;  %2491 = vmatprep.subr.mxu1 %v2775_v0 }
 0x17a   :  { %2458 = vmatprep.subr.mxu0 %v2775_v0  ;;  %2492 = vmatpush3.msra.mxu1 %v1415_v48  ;;  %v1450_v48 = vand.u32 4294901760, %v1449_v19  ;;  %v1463_v36 = vsub.f32 %v3448_v8, %v3665_v30  ;;  %v3664_v40 = vand.u32 4294901760, %v3463_v46 }
 0x17b   :  { %2459 = vmatpush3.msra.mxu0 %v3377_v25  ;;  %2493 = vmatprep.subr.mxu1 %v2775_v0 }
 0x17c   :  { %2460 = vmatprep.subr.mxu0 %v2775_v0  ;;  %2494 = vmatpush3.msra.mxu1 %v1422_v41  ;;  %v1464_v41 = vand.u32 4294901760, %v1463_v36  ;;  %v1470_v44 = vsub.f32 %v3463_v46, %v3664_v40 }
 0x17d   :  { %2461 = vmatpush3.msra.mxu0 %v3385_v33  ;;  %2495 = vmatprep.subr.mxu1 %v2775_v0 }
 0x17e   :  { %2462 = vmatprep.subr.mxu0 %v2775_v0  ;;  %2496 = vmatpush3.msra.mxu1 %v1429_v4  ;;  %v1471_v63 = vand.u32 4294901760, %v1470_v44 }
 0x17f   :  { %2463 = vmatpush3.msra.mxu0 %v3394_v3  ;;  %2497 = vmatprep.subr.mxu1 %v2775_v0 }
 0x180   :  { %2464 = vmatprep.subr.mxu0 %v2775_v0  ;;  %2498 = vmatpush3.msra.mxu1 %v1436_v2 }
 0x181   :  { %2465 = vmatpush3.msra.mxu0 %v3406_v39  ;;  %2499 = vmatprep.subr.mxu1 %v2775_v0 }
 0x182   :  { %2466 = vmatprep.subr.mxu0 %v2775_v0  ;;  %2500 = vmatpush3.msra.mxu1 %v1443_v60 }
 0x183   :  { %2467 = vmatpush3.msra.mxu0 %v3420_v57  ;;  %2501 = vmatprep.subr.mxu1 %v2775_v0 }
 0x184   :  { %2468 = vmatprep.subr.mxu0 %v2775_v0  ;;  %2502 = vmatpush3.msra.mxu1 %v1450_v48 }
 0x185   :  { %2469 = vmatpush3.msra.mxu0 %v3427_v45  ;;  %2503 = vmatprep.subr.mxu1 %v2775_v0 }
 0x186   :  { %2470 = vmatprep.subr.mxu0 %v2775_v0  ;;  %2504 = vmatpush3.msra.mxu1 %v1457_v34 }
 0x187   :  { %2471 = vmatpush3.msra.mxu0 %v3440_v24  ;;  %2505 = vmatprep.subr.mxu1 %v2775_v0 }
 0x188   :  { %2472 = vmatprep.subr.mxu0 %v2775_v0  ;;  %2506 = vmatpush3.msra.mxu1 %v1464_v41 }
 0x189   :  { %2473 = vmatpush3.msra.mxu0 %v3450_v15  ;;  %2507 = vmatprep.subr.mxu1 %v2775_v0 }
 0x18a   :  { %2512 = vmatprep.subr.mxu0 %v2775_v0  ;;  %2508 = vmatpush3.msra.mxu1 %v1471_v63 }
 0x18b   :  { %2547 = vmatprep.subr.mxu1 %v2775_v0 }
 0x1e0   :  { %v843_v4 = vpop.f32.mrf.mxu1 }
 0x1e2   :  { %v2301_v5 = vpop.f32.mrf.mxu1 }
 0x1e8   :  { %v692_v1 = vpop.f32.mrf.mxu0 }
 0x1e9   :  { %v693_v48 = vadd.f32 %v1930_v26, %v692_v1 }
 0x1ea   :  { %v2266_v2 = vpop.f32.mrf.mxu0 }
 0x1eb   :  { %v844_v36 = vadd.f32 %v843_v4, %v693_v48 }
 0x200   :  { %v1036_v13 = vpop.f32.mrf.mxu1 }
 0x202   :  { %v2371_v55 = vpop.f32.mrf.mxu1 }
 0x209   :  { %v947_v60 = vpop.f32.mrf.mxu0 }
 0x20a   :  { %v948_v44 = vadd.f32 %v947_v60, %v844_v36 }
 0x20b   :  { %v2336_v19 = vpop.f32.mrf.mxu0 }
 0x20c   :  { %v1037_v63 = vadd.f32 %v1036_v13, %v948_v44 }
 0x222   :  { %v1242_v34 = vpop.f32.mrf.mxu1 }
 0x224   :  { %v2441_v41 = vpop.f32.mrf.mxu1 }
 0x22a   :  { %v1155_v40 = vpop.f32.mrf.mxu0 }
 0x22b   :  { %v1156_v30 = vadd.f32 %v1155_v40, %v1037_v63 }
 0x22c   :  { %v2406_v7 = vpop.f32.mrf.mxu0 }
 0x22d   :  { %v1243_v5 = vadd.f32 %v1242_v34, %v1156_v30 }
 0x22f   :  { %v1246_v31 = vmax.f32 %v1243_v5, 0.0 }
 0x231   :  { %v3483_v2 = vand.u32 4294901760, %v1246_v31 }
 0x233   :  { %v3486_v55 = vsub.f32 %v1246_v31, %v3483_v2  ;;  %2510 = vmatmul.mubr.f32.vlgmr.msra.gmra.mxu1 %v3483_v2 }
 0x234   :  { %2548 = vmatpush3.msra.mxu1 %v3288_v42  ;;  %2579 = vmatprep.mubr.msk.f32.mxu1 %vm2776_vm0, %v2775_v0 }
 0x235   :  { %v1353_v4 = vand.u32 4294901760, %v3486_v55  ;;  %2549 = vmatprep.subr.mxu1 %v2775_v0 }
 0x236   :  { %2550 = vmatpush3.msra.mxu1 %v3293_v53 }
 0x237   :  { %2551 = vmatprep.subr.mxu1 %v2775_v0  ;;  %v1354_v7 = vsub.f32 %v3486_v55, %v1353_v4 }
 0x238   :  { %2552 = vmatpush3.msra.mxu1 %v3296_v58 }
 0x239   :  { %2553 = vmatprep.subr.mxu1 %v2775_v0  ;;  %v1355_v31 = vand.u32 4294901760, %v1354_v7 }
 0x23a   :  { %2554 = vmatpush3.msra.mxu1 %v3298_v61 }
 0x23b   :  { %2555 = vmatprep.subr.mxu1 %v2775_v0  ;;  %2475 = vmatmul.mubr.f32.vlgmr.msra.gmra.mxu0 %v1355_v31 }
 0x23c   :  { %2513 = vmatpush3.msra.mxu0 %v3291_v51  ;;  %2556 = vmatpush3.msra.mxu1 %v3300_v62  ;;  %v3675_v51 = vand.u32 4294901760, %v3438_v14 }
 0x23d   :  { %2514 = vmatprep.subr.mxu0 %v2775_v0  ;;  %2557 = vmatprep.subr.mxu1 %v2775_v0 }
 0x23e   :  { %2515 = vmatpush3.msra.mxu0 %v3305_v10  ;;  %2558 = vmatpush3.msra.mxu1 %v3308_v11 }
 0x23f   :  { %2516 = vmatprep.subr.mxu0 %v2775_v0  ;;  %2559 = vmatprep.subr.mxu1 %v2775_v0 }
 0x240   :  { %2517 = vmatpush3.msra.mxu0 %v3313_v16  ;;  %2560 = vmatpush3.msra.mxu1 %v3310_v12 }
 0x241   :  { %2518 = vmatprep.subr.mxu0 %v2775_v0  ;;  %2561 = vmatprep.subr.mxu1 %v2775_v0 }
 0x242   :  { %2519 = vmatpush3.msra.mxu0 %v3316_v17  ;;  %2562 = vmatpush3.msra.mxu1 %v3322_v21 }
 0x243   :  { %2520 = vmatprep.subr.mxu0 %v2775_v0  ;;  %2563 = vmatprep.subr.mxu1 %v2775_v0 }
 0x244   :  { %2521 = vmatpush3.msra.mxu0 %v3319_v18  ;;  %2564 = vmatpush3.msra.mxu1 %v3377_v25  ;;  %v1931_v18 = vld [vmem:[%s3656_s6] ss:$0 sm:$0xff] }
 0x245   :  { %2522 = vmatprep.subr.mxu0 %v2775_v0  ;;  %2565 = vmatprep.subr.mxu1 %v2775_v0 }
 0x246   :  { %2523 = vmatpush3.msra.mxu0 %v3329_v27  ;;  %2566 = vmatpush3.msra.mxu1 %v3385_v33 }
 0x247   :  { %2524 = vmatprep.subr.mxu0 %v2775_v0  ;;  %2567 = vmatprep.subr.mxu1 %v2775_v0 }
 0x248   :  { %2525 = vmatpush3.msra.mxu0 %v3333_v28  ;;  %2568 = vmatpush3.msra.mxu1 %v3394_v3 }
 0x249   :  { %2526 = vmatprep.subr.mxu0 %v2775_v0  ;;  %2569 = vmatprep.subr.mxu1 %v2775_v0 }
 0x24a   :  { %2527 = vmatpush3.msra.mxu0 %v3345_v52  ;;  %2570 = vmatpush3.msra.mxu1 %v3406_v39 }
 0x24b   :  { %2528 = vmatprep.subr.mxu0 %v2775_v0  ;;  %2571 = vmatprep.subr.mxu1 %v2775_v0 }
 0x24c   :  { %2529 = vmatpush3.msra.mxu0 %v3383_v32  ;;  %2572 = vmatpush3.msra.mxu1 %v3420_v57 }
 0x24d   :  { %2530 = vmatprep.subr.mxu0 %v2775_v0  ;;  %2573 = vmatprep.subr.mxu1 %v2775_v0 }
 0x24e   :  { %2531 = vmatpush3.msra.mxu0 %v3392_v9  ;;  %2574 = vmatpush3.msra.mxu1 %v3427_v45 }
 0x24f   :  { %2532 = vmatprep.subr.mxu0 %v2775_v0  ;;  %2575 = vmatprep.subr.mxu1 %v2775_v0 }
 0x250   :  { %2533 = vmatpush3.msra.mxu0 %v3404_v38  ;;  %2576 = vmatpush3.msra.mxu1 %v3440_v24 }
 0x251   :  { %2534 = vmatprep.subr.mxu0 %v2775_v0  ;;  %2577 = vmatprep.subr.mxu1 %v2775_v0 }
 0x252   :  { %2535 = vmatpush3.msra.mxu0 %v3416_v56  ;;  %2578 = vmatpush3.msra.mxu1 %v3450_v15 }
 0x253   :  { %2536 = vmatprep.subr.mxu0 %v2775_v0  ;;  %2580 = vmatmul.mubr.f32.vlgmr.msra.gmra.mxu1 %v1353_v4 }
 0x254   :  { %2617 = vmatprep.subr.mxu1 %v2775_v0  ;;  %2537 = vmatpush3.msra.mxu0 %v3431_v49 }
 0x255   :  { %2618 = vmatpush3.msra.mxu1 %v3288_v42  ;;  %2538 = vmatprep.subr.mxu0 %v2775_v0  ;;  %v3674_v42 = vand.u32 4294901760, %v3431_v49 }
 0x256   :  { %2619 = vmatprep.subr.mxu1 %v2775_v0  ;;  %2539 = vmatpush3.msra.mxu0 %v3438_v14 }
 0x257   :  { %2620 = vmatpush3.msra.mxu1 %v3293_v53  ;;  %2540 = vmatprep.subr.mxu0 %v2775_v0  ;;  %v3676_v53 = vand.u32 4294901760, %v3448_v8 }
 0x258   :  { %2621 = vmatprep.subr.mxu1 %v2775_v0  ;;  %2541 = vmatpush3.msra.mxu0 %v3448_v8 }
 0x259   :  { %2622 = vmatpush3.msra.mxu1 %v3296_v58  ;;  %2542 = vmatprep.subr.mxu0 %v2775_v0  ;;  %v3677_v58 = vand.u32 4294901760, %v3463_v46 }
 0x25a   :  { %2623 = vmatprep.subr.mxu1 %v2775_v0  ;;  %2543 = vmatpush3.msra.mxu0 %v3463_v46 }
 0x25b   :  { %2544 = vmatprep.mubr.msk.f32.mxu0 %vm2776_vm0, %v2775_v0  ;;  %2624 = vmatpush3.msra.mxu1 %v3298_v61 }
 0x25c   :  { %2545 = vmatmul.mubr.f32.vlgmr.msra.gmra.mxu0 %v3486_v55  ;;  %2582 = vmatprep.subr.mxu0 %v2775_v0 }
 0x25d   :  { %2625 = vmatprep.subr.mxu1 %v2775_v0  ;;  %2583 = vmatpush3.msra.mxu0 %v1364_v6 }
 0x25e   :  { %2626 = vmatpush3.msra.mxu1 %v3300_v62  ;;  %2584 = vmatprep.subr.mxu0 %v2775_v0 }
 0x25f   :  { %2627 = vmatprep.subr.mxu1 %v2775_v0  ;;  %2585 = vmatpush3.msra.mxu0 %v1371_v23 }
 0x260   :  { %2628 = vmatpush3.msra.mxu1 %v3308_v11  ;;  %2586 = vmatprep.subr.mxu0 %v2775_v0 }
 0x261   :  { %2629 = vmatprep.subr.mxu1 %v2775_v0  ;;  %2587 = vmatpush3.msra.mxu0 %v1378_v29 }
 0x262   :  { %2630 = vmatpush3.msra.mxu1 %v3310_v12  ;;  %2588 = vmatprep.subr.mxu0 %v2775_v0 }
 0x263   :  { %2631 = vmatprep.subr.mxu1 %v2775_v0  ;;  %2589 = vmatpush3.msra.mxu0 %v1385_v35 }
 0x264   :  { %2632 = vmatpush3.msra.mxu1 %v3322_v21  ;;  %2590 = vmatprep.subr.mxu0 %v2775_v0 }
 0x265   :  { %2633 = vmatprep.subr.mxu1 %v2775_v0  ;;  %2591 = vmatpush3.msra.mxu0 %v1392_v43 }
 0x266   :  { %2634 = vmatpush3.msra.mxu1 %v3377_v25  ;;  %2592 = vmatprep.subr.mxu0 %v2775_v0 }
 0x267   :  { %2635 = vmatprep.subr.mxu1 %v2775_v0  ;;  %2593 = vmatpush3.msra.mxu0 %v1399_v50 }
 0x268   :  { %2636 = vmatpush3.msra.mxu1 %v3385_v33  ;;  %2594 = vmatprep.subr.mxu0 %v2775_v0 }
 0x269   :  { %2637 = vmatprep.subr.mxu1 %v2775_v0  ;;  %2595 = vmatpush3.msra.mxu0 %v1406_v20 }
 0x26a   :  { %2638 = vmatpush3.msra.mxu1 %v3394_v3  ;;  %2596 = vmatprep.subr.mxu0 %v2775_v0 }
 0x26b   :  { %2639 = vmatprep.subr.mxu1 %v2775_v0  ;;  %2597 = vmatpush3.msra.mxu0 %v1413_v59 }
 0x26c   :  { %2640 = vmatpush3.msra.mxu1 %v3406_v39  ;;  %2598 = vmatprep.subr.mxu0 %v2775_v0 }
 0x26d   :  { %2641 = vmatprep.subr.mxu1 %v2775_v0  ;;  %2599 = vmatpush3.msra.mxu0 %v1420_v47 }
 0x26e   :  { %2642 = vmatpush3.msra.mxu1 %v3420_v57  ;;  %2600 = vmatprep.subr.mxu0 %v2775_v0 }
 0x26f   :  { %2643 = vmatprep.subr.mxu1 %v2775_v0  ;;  %2601 = vmatpush3.msra.mxu0 %v1427_v37 }
 0x270   :  { %2644 = vmatpush3.msra.mxu1 %v3427_v45  ;;  %2602 = vmatprep.subr.mxu0 %v2775_v0 }
 0x271   :  { %2645 = vmatprep.subr.mxu1 %v2775_v0  ;;  %2603 = vmatpush3.msra.mxu0 %v1434_v54 }
 0x272   :  { %2646 = vmatpush3.msra.mxu1 %v3440_v24  ;;  %2604 = vmatprep.subr.mxu0 %v2775_v0 }
 0x273   :  { %2647 = vmatprep.subr.mxu1 %v2775_v0  ;;  %2605 = vmatpush3.msra.mxu0 %v1441_v22 }
 0x274   :  { %2648 = vmatpush3.msra.mxu1 %v3450_v15  ;;  %2649 = vmatprep.mubr.msk.f32.mxu1 %vm2776_vm0, %v2775_v0 }
 0x275   :  { %2606 = vmatprep.subr.mxu0 %v2775_v0  ;;  %2650 = vmatmul.mubr.f32.vlgmr.msra.gmra.mxu1 %v3483_v2 }
 0x276   :  { %2607 = vmatpush3.msra.mxu0 %v3674_v42  ;;  %2614 = vmatprep.mubr.msk.f32.mxu0 %vm2776_vm0, %v2775_v0 }
 0x277   :  { %2608 = vmatprep.subr.mxu0 %v2775_v0 }
 0x278   :  { %2609 = vmatpush3.msra.mxu0 %v3675_v51 }
 0x279   :  { %2610 = vmatprep.subr.mxu0 %v2775_v0 }
 0x27a   :  { %2611 = vmatpush3.msra.mxu0 %v3676_v53 }
 0x27b   :  { %2612 = vmatprep.subr.mxu0 %v2775_v0 }
 0x27c   :  { %2613 = vmatpush3.msra.mxu0 %v3677_v58 }
 0x27d   :  { %2615 = vmatmul.mubr.f32.vlgmr.msra.gmra.mxu0 %v3483_v2 }
 0x2f3   :  { %v1508_v61 = vpop.f32.mrf.mxu1 }
 0x2f5   :  { %v2511_v62 = vpop.f32.mrf.mxu1 }
 0x2fb   :  { %v1357_v6 = vpop.f32.mrf.mxu0 }
 0x2fc   :  { %v1358_v21 = vadd.f32 %v1931_v18, %v1357_v6 }
 0x2fd   :  { %v2476_v10 = vpop.f32.mrf.mxu0 }
 0x2fe   :  { %v1509_v0 = vadd.f32 %v1508_v61, %v1358_v21 }
 0x313   :  { %v1701_v11 = vpop.f32.mrf.mxu1 }
 0x315   :  { %v2581_v12 = vpop.f32.mrf.mxu1 }
 0x31c   :  { %v1612_v16 = vpop.f32.mrf.mxu0 }
 0x31d   :  { %v1613_v28 = vadd.f32 %v1612_v16, %v1509_v0 }
 0x31e   :  { %v2546_v17 = vpop.f32.mrf.mxu0 }
 0x31f   :  { %v1702_v29 = vadd.f32 %v1701_v11, %v1613_v28 }
 0x335   :  { %v1907_v23 = vpop.f32.mrf.mxu1 }
 0x337   :  { %v2651_v27 = vpop.f32.mrf.mxu1 }
 0x33d   :  { %v1820_v35 = vpop.f32.mrf.mxu0 }
 0x33e   :  { %v1821_v43 = vadd.f32 %v1820_v35, %v1702_v29 }
 0x33f   :  { %v2616_v50 = vpop.f32.mrf.mxu0 }
 0x340   :  { %v1908_v52 = vadd.f32 %v1907_v23, %v1821_v43 }
 0x342   :  { %1911 = vst [vmem:[#allocation10] sm:$0xff] %v1908_v52 }
 0x343   :  { %2752 = shalt.err (!%p2749_p10)
}
 0x344   :  { %1921 = dma.vmem_to_hbm [thread:$0]  %s1919_s24, 128, %s3657_s7, [#allocation4]  }
 0x345   :  { %2767 = dma.done.wait [#allocation4], 128  }
 0x346   :  { %2768 = vsyncadd [#allocation4], 4294967168 }
 0x347   :  { %1925 = vsyncpa [#allocation3], 1 }
 0x348   :  { %1926 = vsyncpa [#allocation6], 1 }
 0x349   :  { %1927 = vsyncpa [#allocation9], 1 }
 0x34a   :  { %1928 = vsyncpa [#allocation4], 1 }

</bundles_post_ra>
